<compile_context>
chip_gen: v7x
topology: tpu7x:2x2x1
jax: 0.10.0
libtpu: 0.0.40
codegen_flags: <defaults>
</compile_context>

<pallas_src>
import jax
import jax.numpy as jnp
from jax.experimental import pallas as pl
from jax.experimental.pallas import tpu as pltpu


def gcn_layer_kernel(adj_ref, x_ref, w_ref, b_ref, o_ref):
    # adj_ref: (N, N)          x_ref: (Bt, N, F)
    # w_ref:   (F, Fout)       b_ref: (1, Fout) f32     o_ref: (Bt, N, Fout) f32
    Bt, N, F = x_ref.shape
    Fout = w_ref.shape[1]

    adj = adj_ref[...]            # read once, shared by all batches
    bias = b_ref[...]             # (1, Fout), f32 (VPU work stays f32)

    # --- Linear first (matmul reassociation): ONE merged MXU matmul over the
    # whole batch block.  Reshapes only collapse/expand leading dims (free
    # re-indexing since N % 8 == 0).
    x2 = x_ref[...].reshape(Bt * N, F)
    z = jnp.dot(x2, w_ref[...], preferred_element_type=jnp.float32)  # (Bt*N, Fout) f32
    z3 = z.astype(adj.dtype).reshape(Bt, N, Fout)

    # --- Graph aggregation: per-batch plain 2-D matmuls (no adj broadcast,
    # no batched dot_general).  Bt is a static Python int -> fully unrolled.
    for b in range(Bt):
        h = jnp.dot(adj, z3[b], preferred_element_type=jnp.float32)  # (N, Fout) f32
        o_ref[b] = jnp.maximum(h + bias, 0.0).astype(o_ref.dtype)


def prepare_gcn_params(adj, w, b, *, compute_dtype=jnp.float32):
    """Per-layer prep, hoisted out of the per-call path (cast/reshape once).

    adj: (N, N); w: (F, Fout) (already (in, out)); b: (Fout,).
    compute_dtype: jnp.float32 or jnp.bfloat16 (bf16 recommended on v6e/v7x;
    accumulation / bias / ReLU / stores remain f32 either way).
    """
    adj_c = jnp.asarray(adj, compute_dtype)
    w_c = jnp.asarray(w, compute_dtype)
    b_2d = jnp.asarray(b, jnp.float32).reshape(1, -1)
    return adj_c, w_c, b_2d


def _vmem_plan(B, N, F, Fout, compute_dtype):
    """Derive (block_b, vmem_limit_bytes) from a per-generation VMEM budget."""
    dsz = jnp.dtype(compute_dtype).itemsize
    try:
        kind = jax.devices()[0].device_kind.lower()
    except Exception:  # pragma: no cover - conservative fallback
        kind = ""
    if "v7" in kind:              # v7x: 64 MiB physical VMEM per core
        budget, vmem_limit = 32 << 20, 48 << 20
    else:                         # v5e / v6e: 128 MiB physical VMEM
        budget, vmem_limit = 64 << 20, 96 << 20

    # Single-buffered constants + double-buffered x/out blocks + f32 scratch.
    fixed = N * N * dsz + F * Fout * dsz + Fout * 4
    per_b = 2 * N * F * dsz + 2 * N * Fout * 4 + 2 * N * Fout * 4
    avail = max(budget - fixed, per_b)
    block_b = int(max(1, min(B, avail // per_b)))
    block_b = min(block_b, 32)    # bound the unrolled aggregation loop

    # Keep >=2 grid steps (megacore / v7x dual-TC) once per-step work clearly
    # exceeds the ~0.35us grid-step overhead; at toy shapes stay single-step.
    per_batch_flops = 2 * N * Fout * (N + F)
    if B >= 2 and per_batch_flops >= (1 << 21):
        block_b = min(block_b, pl.cdiv(B, 2))
    return block_b, vmem_limit


def gcn_layer_apply(x, adj_c, w_c, b_2d, *, block_b=None):
    """x: (B, N, F) f32; adj_c/w_c pre-cast via prepare_gcn_params; b_2d: (1, Fout) f32."""
    B, N, F = x.shape
    F_w, Fout = w_c.shape
    assert F_w == F, "weight / in-feature mismatch"
    assert adj_c.shape == (N, N), "adjacency / node-count mismatch"
    compute_dtype = w_c.dtype

    # Sublane alignment: zero-pad nodes to a multiple of 8 so the in-kernel
    # leading-dim reshapes stay free (zero adj rows/cols are semantically inert;
    # padded output rows are sliced away below).
    Np = pl.cdiv(N, 8) * 8
    if Np != N:
        adj_c = jnp.zeros((Np, Np), adj_c.dtype).at[:N, :N].set(adj_c)
        x = jnp.pad(x, ((0, 0), (0, Np - N), (0, 0)))

    x_c = x.astype(compute_dtype)

    plan_block_b, vmem_limit = _vmem_plan(B, Np, F, Fout, compute_dtype)
    if block_b is None:
        block_b = plan_block_b
    block_b = int(max(1, min(block_b, B)))

    grid_b = pl.cdiv(B, block_b)
    Bp = grid_b * block_b
    if Bp != B:
        # Pad the batch so the last grid step never reads an OOB x block.
        x_c = jnp.pad(x_c, ((0, Bp - B), (0, 0), (0, 0)))

    # TODO(synk): for node counts so large that adj alone overflows the v7x
    # VMEM budget, add a second grid axis tiling adj rows (aggregation-first
    # ordering) instead of only shrinking block_b.

    def _run(single_buffer_constants):
        if single_buffer_constants:
            const_kw = dict(pipeline_mode=pl.Buffered(buffer_count=1))
        else:
            const_kw = {}
        grid_spec = pl.GridSpec(
            grid=(grid_b,),
            in_specs=[
                # Grid-invariant operands: single-buffered (no 2x VMEM copy).
                pl.BlockSpec((Np, Np), lambda i: (0, 0), **const_kw),        # adj
                pl.BlockSpec((block_b, Np, F), lambda i: (i, 0, 0)),          # x block
                pl.BlockSpec((F, Fout), lambda i: (0, 0), **const_kw),        # W
                pl.BlockSpec((1, Fout), lambda i: (0, 0), **const_kw),        # bias
            ],
            out_specs=pl.BlockSpec((block_b, Np, Fout), lambda i: (i, 0, 0)),
        )
        return pl.pallas_call(
            gcn_layer_kernel,
            out_shape=jax.ShapeDtypeStruct((Bp, Np, Fout), jnp.float32),
            grid_spec=grid_spec,
            compiler_params=pltpu.CompilerParams(
                dimension_semantics=("parallel",),
                vmem_limit_bytes=vmem_limit,
            ),
        )(adj_c, x_c, w_c, b_2d)

    try:
        # Single-buffer the grid-invariant adj/W/bias blocks (pure VMEM saving).
        out = _run(True)
    except Exception:
        # Fallback: default double-buffering if this JAX build does not accept
        # pipeline_mode on top-level pallas_call BlockSpecs.
        out = _run(False)

    if Bp != B or Np != N:
        out = out[:B, :N, :]
    return out


def gcn_layer(x, adj, w, b, *, compute_dtype=jnp.float32, block_b=None):
    """Convenience one-shot wrapper (prefer prepare_gcn_params + gcn_layer_apply
    inside a model so the weight cast is paid once per layer, not per call)."""
    adj_c, w_c, b_2d = prepare_gcn_params(adj, w, b, compute_dtype=compute_dtype)
    return gcn_layer_apply(x, adj_c, w_c, b_2d, block_b=block_b)


def gcn_layer_ref(x, adj, w, b):
    """Pure-JAX reference matching the PyTorch forward (aggregation then linear)."""
    h = jnp.einsum("nm,bmf->bnf", adj, x)
    return jnp.maximum(h @ w + b, 0.0)


if __name__ == "__main__":
    # Small shapes consistent with the module: batch=2, N=16 nodes,
    # num_of_features (T*D) = 32, num_of_filter = 64.
    B, N, Fin, Fout = 2, 16, 32, 64

    key = jax.random.PRNGKey(0)
    k_x, k_adj, k_w, k_b = jax.random.split(key, 4)

    x = jax.random.normal(k_x, (B, N, Fin), dtype=jnp.float32)
    adj = jax.random.uniform(k_adj, (N, N), dtype=jnp.float32)

    # Deterministic nn.Linear-style params (W stored as (in, out) for the kernel).
    bound = 1.0 / (Fin ** 0.5)
    w = jax.random.uniform(k_w, (Fin, Fout), minval=-bound, maxval=bound,
                           dtype=jnp.float32)
    b = jax.random.uniform(k_b, (Fout,), minval=-bound, maxval=bound,
                           dtype=jnp.float32)

    ref = gcn_layer_ref(x, adj, w, b)

    # f32 path: tight check against the PyTorch-equivalent reference.
    adj_c, w_c, b_2d = prepare_gcn_params(adj, w, b, compute_dtype=jnp.float32)
    out_f32 = jax.block_until_ready(gcn_layer_apply(x, adj_c, w_c, b_2d))
    assert out_f32.shape == (B, N, Fout)
    assert jnp.allclose(out_f32, ref, atol=1e-4, rtol=1e-4), "f32 mismatch vs reference"

    # bf16 matmul inputs (recommended on v6e/v7x), f32 accumulation: loose check.
    adj_h, w_h, b_h = prepare_gcn_params(adj, w, b, compute_dtype=jnp.bfloat16)
    out_bf16 = jax.block_until_ready(gcn_layer_apply(x, adj_h, w_h, b_h))
    assert out_bf16.shape == (B, N, Fout)
    assert jnp.allclose(out_bf16, ref, atol=5e-2, rtol=5e-2), "bf16 mismatch vs reference"

    print("KERNEL_OK")
</pallas_src>

<mosaic_0001>
module attributes {stable_mosaic.version = 11 : i64} {
  func.func @gcn_layer_kernel(%arg0: i32, %arg1: memref<16x16xf32, #tpu.memory_space<vmem>>, %arg2: memref<2x16x32xf32, #tpu.memory_space<vmem>>, %arg3: memref<32x64xf32, #tpu.memory_space<vmem>>, %arg4: memref<1x64xf32, #tpu.memory_space<vmem>>, %arg5: memref<2x16x64xf32, #tpu.memory_space<vmem>>) attributes {dimension_semantics = [#tpu.dimension_semantics<parallel>], iteration_bounds = array<i64: 1>, scalar_prefetch = 0 : i64, scratch_operands = 0 : i64, tpu.core_type = #tpu.core_type<tc>, window_params = [{pipeline_mode = #tpu.pipeline_mode<synchronous>, transform_indices = @transform_0, window_bounds = array<i64: 16, 16>}, {transform_indices = @transform_1, window_bounds = array<i64: 2, 16, 32>}, {pipeline_mode = #tpu.pipeline_mode<synchronous>, transform_indices = @transform_2, window_bounds = array<i64: 32, 64>}, {pipeline_mode = #tpu.pipeline_mode<synchronous>, transform_indices = @transform_3, window_bounds = array<i64: 1, 64>}, {transform_indices = @transform_4, window_bounds = array<i64: 2, 16, 64>}]} {
    %c0 = arith.constant 0 : index
    %c0_0 = arith.constant 0 : index
    %0 = vector.load %arg1[%c0, %c0_0] : memref<16x16xf32, #tpu.memory_space<vmem>>, vector<16x16xf32>
    %c0_1 = arith.constant 0 : index
    %c0_2 = arith.constant 0 : index
    %1 = vector.load %arg4[%c0_1, %c0_2] : memref<1x64xf32, #tpu.memory_space<vmem>>, vector<1x64xf32>
    %c0_3 = arith.constant 0 : index
    %c0_4 = arith.constant 0 : index
    %c0_5 = arith.constant 0 : index
    %2 = vector.load %arg2[%c0_3, %c0_4, %c0_5] : memref<2x16x32xf32, #tpu.memory_space<vmem>>, vector<2x16x32xf32>
    %3 = vector.shape_cast %2 : vector<2x16x32xf32> to vector<32x32xf32>
    %c0_6 = arith.constant 0 : index
    %c0_7 = arith.constant 0 : index
    %4 = vector.load %arg3[%c0_6, %c0_7] : memref<32x64xf32, #tpu.memory_space<vmem>>, vector<32x64xf32>
    %cst = arith.constant dense<0.000000e+00> : vector<32x64xf32>
    %5 = tpu.matmul %3, %4, %cst {dimension_numbers = #tpu.dot_dimension_numbers<[1], [0], [0], [1], [0, 0, 1, 1], [], []>} : vector<32x32xf32>, vector<32x64xf32>, vector<32x64xf32> -> vector<32x64xf32>
    %6 = vector.shape_cast %5 : vector<32x64xf32> to vector<2x16x64xf32>
    %7 = vector.extract_strided_slice %6 {offsets = [0, 0, 0], sizes = [1, 16, 64], strides = [1, 1, 1]} : vector<2x16x64xf32> to vector<1x16x64xf32>
    %8 = vector.shape_cast %7 : vector<1x16x64xf32> to vector<16x64xf32>
    %cst_8 = arith.constant dense<0.000000e+00> : vector<16x64xf32>
    %9 = tpu.matmul %0, %8, %cst_8 {dimension_numbers = #tpu.dot_dimension_numbers<[1], [0], [0], [1], [0, 0, 1, 1], [], []>} : vector<16x16xf32>, vector<16x64xf32>, vector<16x64xf32> -> vector<16x64xf32>
    %10 = vector.broadcast %1 : vector<1x64xf32> to vector<16x64xf32>
    %11 = arith.addf %9, %10 : vector<16x64xf32>
    %cst_9 = arith.constant 0.000000e+00 : f32
    %12 = vector.broadcast %cst_9 : f32 to vector<16x64xf32>
    %13 = arith.maximumf %11, %12 : vector<16x64xf32>
    %c0_10 = arith.constant 0 : index
    %c0_11 = arith.constant 0 : index
    %c0_12 = arith.constant 0 : index
    %14 = vector.load %arg5[%c0_10, %c0_11, %c0_12] : memref<2x16x64xf32, #tpu.memory_space<vmem>>, vector<1x16x64xf32>
    %15 = vector.shape_cast %14 : vector<1x16x64xf32> to vector<16x64xf32>
    %16 = vector.shape_cast %13 : vector<16x64xf32> to vector<1x16x64xf32>
    tpu.vector_store %arg5[%c0_10, %c0_11, %c0_12], %16 {strides = array<i32>} : memref<2x16x64xf32, #tpu.memory_space<vmem>>, vector<1x16x64xf32>,
    %17 = vector.extract_strided_slice %6 {offsets = [1, 0, 0], sizes = [1, 16, 64], strides = [1, 1, 1]} : vector<2x16x64xf32> to vector<1x16x64xf32>
    %18 = vector.shape_cast %17 : vector<1x16x64xf32> to vector<16x64xf32>
    %cst_13 = arith.constant dense<0.000000e+00> : vector<16x64xf32>
    %19 = tpu.matmul %0, %18, %cst_13 {dimension_numbers = #tpu.dot_dimension_numbers<[1], [0], [0], [1], [0, 0, 1, 1], [], []>} : vector<16x16xf32>, vector<16x64xf32>, vector<16x64xf32> -> vector<16x64xf32>
    %20 = vector.broadcast %1 : vector<1x64xf32> to vector<16x64xf32>
    %21 = arith.addf %19, %20 : vector<16x64xf32>
    %cst_14 = arith.constant 0.000000e+00 : f32
    %22 = vector.broadcast %cst_14 : f32 to vector<16x64xf32>
    %23 = arith.maximumf %21, %22 : vector<16x64xf32>
    %c1 = arith.constant 1 : index
    %c0_15 = arith.constant 0 : index
    %c0_16 = arith.constant 0 : index
    %24 = vector.load %arg5[%c1, %c0_15, %c0_16] : memref<2x16x64xf32, #tpu.memory_space<vmem>>, vector<1x16x64xf32>
    %25 = vector.shape_cast %24 : vector<1x16x64xf32> to vector<16x64xf32>
    %26 = vector.shape_cast %23 : vector<16x64xf32> to vector<1x16x64xf32>
    tpu.vector_store %arg5[%c1, %c0_15, %c0_16], %26 {strides = array<i32>} : memref<2x16x64xf32, #tpu.memory_space<vmem>>, vector<1x16x64xf32>,
    return
  }
  func.func @transform_0(%arg0: i32) -> (i32, i32) {
    %c0_i32 = arith.constant 0 : i32
    %c0_i32_0 = arith.constant 0 : i32
    %c0_i32_1 = arith.constant 0 : i32
    return %c0_i32, %c0_i32_0 : i32, i32
  }
  func.func @transform_1(%arg0: i32) -> (i32, i32, i32) {
    %c0_i32 = arith.constant 0 : i32
    %c0_i32_0 = arith.constant 0 : i32
    %c0_i32_1 = arith.constant 0 : i32
    return %arg0, %c0_i32, %c0_i32_0 : i32, i32, i32
  }
  func.func @transform_2(%arg0: i32) -> (i32, i32) {
    %c0_i32 = arith.constant 0 : i32
    %c0_i32_0 = arith.constant 0 : i32
    %c0_i32_1 = arith.constant 0 : i32
    return %c0_i32, %c0_i32_0 : i32, i32
  }
  func.func @transform_3(%arg0: i32) -> (i32, i32) {
    %c0_i32 = arith.constant 0 : i32
    %c0_i32_0 = arith.constant 0 : i32
    %c0_i32_1 = arith.constant 0 : i32
    return %c0_i32, %c0_i32_0 : i32, i32
  }
  func.func @transform_4(%arg0: i32) -> (i32, i32, i32) {
    %c0_i32 = arith.constant 0 : i32
    %c0_i32_0 = arith.constant 0 : i32
    %c0_i32_1 = arith.constant 0 : i32
    return %arg0, %c0_i32, %c0_i32_0 : i32, i32, i32
  }
}

module attributes {stable_mosaic.version = 11 : i64} {
  func.func @gcn_layer_kernel(%arg0: i32, %arg1: memref<16x16xf32, #tpu.memory_space<vmem>>, %arg2: memref<2x16x32xf32, #tpu.memory_space<vmem>>, %arg3: memref<32x64xf32, #tpu.memory_space<vmem>>, %arg4: memref<1x64xf32, #tpu.memory_space<vmem>>, %arg5: memref<2x16x64xf32, #tpu.memory_space<vmem>>) attributes {dimension_semantics = [#tpu.dimension_semantics<parallel>], iteration_bounds = array<i64: 1>, scalar_prefetch = 0 : i64, scratch_operands = 0 : i64, tpu.core_type = #tpu.core_type<tc>, window_params = [{pipeline_mode = #tpu.pipeline_mode<synchronous>, transform_indices = @transform_0, window_bounds = array<i64: 16, 16>}, {transform_indices = @transform_1, window_bounds = array<i64: 2, 16, 32>}, {pipeline_mode = #tpu.pipeline_mode<synchronous>, transform_indices = @transform_2, window_bounds = array<i64: 32, 64>}, {pipeline_mode = #tpu.pipeline_mode<synchronous>, transform_indices = @transform_3, window_bounds = array<i64: 1, 64>}, {transform_indices = @transform_4, window_bounds = array<i64: 2, 16, 64>}]} {
    %c0 = arith.constant 0 : index
    %c0_0 = arith.constant 0 : index
    %0 = vector.load %arg1[%c0, %c0_0] : memref<16x16xf32, #tpu.memory_space<vmem>>, vector<16x16xf32>
    %c0_1 = arith.constant 0 : index
    %c0_2 = arith.constant 0 : index
    %1 = vector.load %arg4[%c0_1, %c0_2] : memref<1x64xf32, #tpu.memory_space<vmem>>, vector<1x64xf32>
    %c0_3 = arith.constant 0 : index
    %c0_4 = arith.constant 0 : index
    %c0_5 = arith.constant 0 : index
    %2 = vector.load %arg2[%c0_3, %c0_4, %c0_5] : memref<2x16x32xf32, #tpu.memory_space<vmem>>, vector<2x16x32xf32>
    %3 = vector.shape_cast %2 : vector<2x16x32xf32> to vector<32x32xf32>
    %c0_6 = arith.constant 0 : index
    %c0_7 = arith.constant 0 : index
    %4 = vector.load %arg3[%c0_6, %c0_7] : memref<32x64xf32, #tpu.memory_space<vmem>>, vector<32x64xf32>
    %cst = arith.constant dense<0.000000e+00> : vector<32x64xf32>
    %5 = tpu.matmul %3, %4, %cst {dimension_numbers = #tpu.dot_dimension_numbers<[1], [0], [0], [1], [0, 0, 1, 1], [], []>} : vector<32x32xf32>, vector<32x64xf32>, vector<32x64xf32> -> vector<32x64xf32>
    %6 = vector.shape_cast %5 : vector<32x64xf32> to vector<2x16x64xf32>
    %7 = vector.extract_strided_slice %6 {offsets = [0, 0, 0], sizes = [1, 16, 64], strides = [1, 1, 1]} : vector<2x16x64xf32> to vector<1x16x64xf32>
    %8 = vector.shape_cast %7 : vector<1x16x64xf32> to vector<16x64xf32>
    %cst_8 = arith.constant dense<0.000000e+00> : vector<16x64xf32>
    %9 = tpu.matmul %0, %8, %cst_8 {dimension_numbers = #tpu.dot_dimension_numbers<[1], [0], [0], [1], [0, 0, 1, 1], [], []>} : vector<16x16xf32>, vector<16x64xf32>, vector<16x64xf32> -> vector<16x64xf32>
    %10 = vector.broadcast %1 : vector<1x64xf32> to vector<16x64xf32>
    %11 = arith.addf %9, %10 : vector<16x64xf32>
    %cst_9 = arith.constant 0.000000e+00 : f32
    %12 = vector.broadcast %cst_9 : f32 to vector<16x64xf32>
    %13 = arith.maximumf %11, %12 : vector<16x64xf32>
    %c0_10 = arith.constant 0 : index
    %c0_11 = arith.constant 0 : index
    %c0_12 = arith.constant 0 : index
    %14 = vector.load %arg5[%c0_10, %c0_11, %c0_12] : memref<2x16x64xf32, #tpu.memory_space<vmem>>, vector<1x16x64xf32>
    %15 = vector.shape_cast %14 : vector<1x16x64xf32> to vector<16x64xf32>
    %16 = vector.shape_cast %13 : vector<16x64xf32> to vector<1x16x64xf32>
    tpu.vector_store %arg5[%c0_10, %c0_11, %c0_12], %16 {strides = array<i32>} : memref<2x16x64xf32, #tpu.memory_space<vmem>>, vector<1x16x64xf32>,
    %17 = vector.extract_strided_slice %6 {offsets = [1, 0, 0], sizes = [1, 16, 64], strides = [1, 1, 1]} : vector<2x16x64xf32> to vector<1x16x64xf32>
    %18 = vector.shape_cast %17 : vector<1x16x64xf32> to vector<16x64xf32>
    %cst_13 = arith.constant dense<0.000000e+00> : vector<16x64xf32>
    %19 = tpu.matmul %0, %18, %cst_13 {dimension_numbers = #tpu.dot_dimension_numbers<[1], [0], [0], [1], [0, 0, 1, 1], [], []>} : vector<16x16xf32>, vector<16x64xf32>, vector<16x64xf32> -> vector<16x64xf32>
    %20 = vector.broadcast %1 : vector<1x64xf32> to vector<16x64xf32>
    %21 = arith.addf %19, %20 : vector<16x64xf32>
    %cst_14 = arith.constant 0.000000e+00 : f32
    %22 = vector.broadcast %cst_14 : f32 to vector<16x64xf32>
    %23 = arith.maximumf %21, %22 : vector<16x64xf32>
    %c1 = arith.constant 1 : index
    %c0_15 = arith.constant 0 : index
    %c0_16 = arith.constant 0 : index
    %24 = vector.load %arg5[%c1, %c0_15, %c0_16] : memref<2x16x64xf32, #tpu.memory_space<vmem>>, vector<1x16x64xf32>
    %25 = vector.shape_cast %24 : vector<1x16x64xf32> to vector<16x64xf32>
    %26 = vector.shape_cast %23 : vector<16x64xf32> to vector<1x16x64xf32>
    tpu.vector_store %arg5[%c1, %c0_15, %c0_16], %26 {strides = array<i32>} : memref<2x16x64xf32, #tpu.memory_space<vmem>>, vector<1x16x64xf32>,
    return
  }
  func.func @transform_0(%arg0: i32) -> (i32, i32) {
    %c0_i32 = arith.constant 0 : i32
    %c0_i32_0 = arith.constant 0 : i32
    %c0_i32_1 = arith.constant 0 : i32
    return %c0_i32, %c0_i32_0 : i32, i32
  }
  func.func @transform_1(%arg0: i32) -> (i32, i32, i32) {
    %c0_i32 = arith.constant 0 : i32
    %c0_i32_0 = arith.constant 0 : i32
    %c0_i32_1 = arith.constant 0 : i32
    return %arg0, %c0_i32, %c0_i32_0 : i32, i32, i32
  }
  func.func @transform_2(%arg0: i32) -> (i32, i32) {
    %c0_i32 = arith.constant 0 : i32
    %c0_i32_0 = arith.constant 0 : i32
    %c0_i32_1 = arith.constant 0 : i32
    return %c0_i32, %c0_i32_0 : i32, i32
  }
  func.func @transform_3(%arg0: i32) -> (i32, i32) {
    %c0_i32 = arith.constant 0 : i32
    %c0_i32_0 = arith.constant 0 : i32
    %c0_i32_1 = arith.constant 0 : i32
    return %c0_i32, %c0_i32_0 : i32, i32
  }
  func.func @transform_4(%arg0: i32) -> (i32, i32, i32) {
    %c0_i32 = arith.constant 0 : i32
    %c0_i32_0 = arith.constant 0 : i32
    %c0_i32_1 = arith.constant 0 : i32
    return %arg0, %c0_i32, %c0_i32_0 : i32, i32, i32
  }
}

</mosaic_0001>

<bundles_post_ra>
// kernel: tpu_custom_call.1
= control target key start
LH: loop header
LB: loop body
LE: loop exit
PB: predicated region body
PF: predicated region fallthrough
CT: control target
= control target key end

     0   :  { %9 = vsyncpa [#allocation3], 0  ;;  %s685_s0 = inlined_call_operand.hbm [shape: f32[16,16], index: 0, kind: input, shape index: {}]   ;;  %s686_s1 = inlined_call_operand.hbm [shape: f32[2,16,32], index: 1, kind: input, shape index: {}]   ;;  %s687_s2 = inlined_call_operand.hbm [shape: f32[32,64], index: 2, kind: input, shape index: {}]   ;;  %s688_s3 = inlined_call_operand.hbm [shape: f32[1,64], index: 3, kind: input, shape index: {}]   ;;  %s689_s4 = inlined_call_operand.hbm [shape: f32[2,16,64], index: 4, kind: output, shape index: {}]  }
   0x1   :  { %10 = vsyncpa [#allocation6], 0 }
   0x2   :  { %11 = vsyncpa [#allocation9], 0 }
   0x3   :  { %12 = vsyncpa [#allocation4], 0  ;;  %s566_s15 = smov [#allocation5]   ;;  %s567_s17 = smov [#allocation2]  }
   0x4   :  { %s30_s16 = sshll.u32 %s566_s15, 4  ;;  %s18_s18 = sshll.u32 %s567_s17, 4  ;;  %s31_s16 = int_to_ptr.vmem [resolvable:$true] %s30_s16  ;;  %s598_s18 = int_to_ptr.vmem [resolvable:$true] %s18_s18 }
   0x5   :  { %s448_s21 = scalar_lea.hbm %s686_s1, 512 }
   0x6   :  { %p449_p0 = scmp.ne.s32.totalorder %s686_s1, %s448_s21  ;;  %p452_p1 = scmp.lt.u32.totalorder %s448_s21, %s686_s1 }
   0x8   :  { %p454_p2 = pnand %p452_p1, %p449_p0 }
   0xa   :  { %457 = shalt.err (!%p454_p2)
}
   0xb   :  { %s458_s26 = scalar_lea.vmem %s31_s16, 512  ;;  %p463_p4 = scmp.lt.s32.totalorder %s31_s16, %s31_s16 }
   0xc   :  { %p459_p3 = scmp.ne.s32.totalorder %s31_s16, %s458_s26  ;;  %p464_p5 = scmp.lt.s32.totalorder %s458_s26, %s458_s26 }
   0xe   :  { %p465_p6 = por %p464_p5, %p463_p4 }
  0x10   :  { %p466_p7 = pnand %p465_p6, %p459_p3 }
  0x12   :  { %469 = shalt.err (!%p466_p7)
}
  0x13   :  { %s568_s27 = smov 128   ;;  %s569_s28 = smov 8  }
  0x14   :  { %36 = dma.hbm_to_vmem [thread:$0]  %s686_s1, 512, %s31_s16, [#allocation6], %s568_s27, %s568_s27, %s569_s28  }
  0x15   :  { %s470_s7 = scalar_lea.hbm %s685_s0, 256 }
  0x16   :  { %p471_p8 = scmp.ne.s32.totalorder %s685_s0, %s470_s7  ;;  %p474_p9 = scmp.lt.u32.totalorder %s470_s7, %s685_s0 }
  0x18   :  { %p476_p10 = pnand %p474_p9, %p471_p8 }
  0x1a   :  { %479 = shalt.err (!%p476_p10)
}
  0x1b   :  { %s480_s12 = scalar_lea.vmem %s598_s18, 256  ;;  %p485_p12 = scmp.lt.s32.totalorder %s598_s18, %s598_s18 }
  0x1c   :  { %p481_p11 = scmp.ne.s32.totalorder %s598_s18, %s480_s12  ;;  %p486_p13 = scmp.lt.s32.totalorder %s480_s12, %s480_s12 }
  0x1e   :  { %p487_p0 = por %p486_p13, %p485_p12 }
  0x20   :  { %p488_p1 = pnand %p487_p0, %p481_p11 }
  0x22   :  { %491 = shalt.err (!%p488_p1)
}
  0x23   :  { %24 = dma.hbm_to_vmem [thread:$0]  %s685_s0, 256, %s598_s18, [#allocation3], %s568_s27, %s568_s27, %s569_s28  }
  0x24   :  { %s570_s14 = smov [#allocation7]   ;;  %s571_s16 = smov [#allocation8]  }
  0x25   :  { %s42_s15 = sshll.u32 %s570_s14, 4  ;;  %s55_s17 = sshll.u32 %s571_s16, 4  ;;  %s43_s15 = int_to_ptr.vmem [resolvable:$true] %s42_s15  ;;  %s56_s17 = int_to_ptr.vmem [resolvable:$true] %s55_s17 }
  0x26   :  { %s492_s21 = scalar_lea.hbm %s687_s2, 512 }
  0x27   :  { %p493_p2 = scmp.ne.s32.totalorder %s687_s2, %s492_s21  ;;  %p496_p3 = scmp.lt.u32.totalorder %s492_s21, %s687_s2 }
  0x29   :  { %p498_p4 = pnand %p496_p3, %p493_p2 }
  0x2b   :  { %501 = shalt.err (!%p498_p4)
}
  0x2c   :  { %s502_s0 = scalar_lea.vmem %s43_s15, 512  ;;  %p507_p6 = scmp.lt.s32.totalorder %s43_s15, %s43_s15 }
  0x2d   :  { %p503_p5 = scmp.ne.s32.totalorder %s43_s15, %s502_s0  ;;  %p508_p7 = scmp.lt.s32.totalorder %s502_s0, %s502_s0 }
  0x2f   :  { %p509_p8 = por %p508_p7, %p507_p6 }
  0x31   :  { %p510_p9 = pnand %p509_p8, %p503_p5 }
  0x33   :  { %513 = shalt.err (!%p510_p9)
}
  0x34   :  { %48 = dma.hbm_to_vmem [thread:$0]  %s687_s2, 512, %s43_s15, [#allocation6], %s568_s27, %s568_s27, %s569_s28  }
  0x35   :  { %s514_s5 = scalar_lea.hbm %s688_s3, 16 }
  0x36   :  { %p515_p10 = scmp.ne.s32.totalorder %s688_s3, %s514_s5  ;;  %p518_p11 = scmp.lt.u32.totalorder %s514_s5, %s688_s3 }
  0x38   :  { %p520_p12 = pnand %p518_p11, %p515_p10 }
  0x3a   :  { %523 = shalt.err (!%p520_p12)
}
  0x3b   :  { %s524_s10 = scalar_lea.vmem %s56_s17, 16  ;;  %s528_s11 = scalar_lea.vmem %s56_s17, 32 }
  0x3c   :  { %p525_p13 = scmp.ne.s32.totalorder %s56_s17, %s524_s10  ;;  %p529_p0 = scmp.lt.s32.totalorder %s56_s17, %s56_s17 }
  0x3d   :  { %p530_p1 = scmp.lt.s32.totalorder %s528_s11, %s524_s10 }
  0x3f   :  { %p531_p2 = por %p530_p1, %p529_p0 }
  0x41   :  { %p532_p3 = pnand %p531_p2, %p525_p13 }
  0x43   :  { %535 = shalt.err (!%p532_p3)
}
  0x44   :  { %58 = dma.hbm_to_vmem [thread:$0]  %s688_s3, 16, %s56_s17, [#allocation9]  }
  0x45   :  { %558 = dma.done.wait [#allocation3], 256  }
  0x46   :  { %559 = vsyncadd [#allocation3], 4294967040 }
  0x47   :  { %560 = dma.done.wait [#allocation6], 1024  }
  0x48   :  { %561 = vsyncadd [#allocation6], 4294966272 }
  0x49   :  { %562 = dma.done.wait [#allocation9], 16  }
  0x4a   :  { %563 = vsyncadd [#allocation9], 4294967280  ;;  %vm82_vm0 = vcmask 261120   ;;  %v78_v0 = vld [vmem:[#allocation7] sm:$0xff]  ;;  %v79_v1 = vld [vmem:[#allocation7 + $0x8] sm:$0xff]  ;;  %vm186_vm1 = vcmask 130048  }
  0x4b   :  { %v80_v2 = vld [vmem:[#allocation7 + $0x10] sm:$0xff]  ;;  %v425_v3 = vpack.c.bf16 %v79_v1, %v78_v0  ;;  %v81_v4 = vld [vmem:[#allocation7 + $0x18] sm:$0xff]  ;;  %v74_v5 = vld [vmem:[#allocation5] sm:$0xff]  ;;  %vm270_vm2 = vcmask 523264   ;;  %s572_s3 = smov [#allocation10]  }
  0x4c   :  { %v429_v6 = vpack.c.bf16 %v81_v4, %v80_v2  ;;  %405 = vmatprep.mubr.msk.f32.mxu0 %vm82_vm0, %v74_v5  ;;  %v75_v7 = vld [vmem:[#allocation5 + $0x8] sm:$0xff]  ;;  %v76_v8 = vld [vmem:[#allocation5 + $0x10] sm:$0xff]  ;;  %v77_v9 = vld [vmem:[#allocation5 + $0x18] sm:$0xff]  ;;  %s358_s1 = sshll.u32 %s572_s3, 4  ;;  %s359_s1 = int_to_ptr.vmem [resolvable:$true] %s358_s1 }
  0x4d   :  { %426 = vmatprep.subr.bf16.mxu0 %v425_v3  ;;  %v71_v10 = vld [vmem:[#allocation2] sm:$0xff]  ;;  %v72_v16 = vld [vmem:[#allocation2 + $0x8] sm:$0xff]  ;;  %v376_v18 = vld [vmem:[#allocation8] ss:$0 sm:$0xff]  ;;  %s536_s13 = scalar_lea.vmem %s359_s1, 512  ;;  %p541_p5 = scmp.lt.s32.totalorder %s359_s1, %s359_s1 }
  0x4e   :  { %428 = vmatpush3.bf16.msra.mxu0 %v425_v3  ;;  %415 = vmatprep.mubr.msk.f32.mxu1 %vm186_vm1, %v71_v10  ;;  %p537_p4 = scmp.ne.s32.totalorder %s359_s1, %s536_s13  ;;  %p542_p6 = scmp.lt.s32.totalorder %s536_s13, %s536_s13 }
  0x4f   :  { %430 = vmatprep.subr.bf16.mxu0 %v429_v6 }
  0x50   :  { %p543_p7 = por %p542_p6, %p541_p5 }
  0x52   :  { %432 = vmatpush3.bf16.msra.mxu0 %v429_v6  ;;  %p544_p8 = pnand %p543_p7, %p537_p4 }
  0x55   :  { %406 = vmatmul.mubr.msk.f32.vlgmr.msra.gmra.mrb[0].mxu0 %vm82_vm0, %v75_v7 }
  0x56   :  { %408 = vmatprep.mubr.msk.f32.mxu0 %vm82_vm0, %v76_v8 }
  0x59   :  { %409 = vmatmul.mubr.msk.f32.gmra.mrb[2].mxu0 %vm82_vm0, %v77_v9 }
 0x128   :  { %v407_v11 = vpop.f32.mrb[0].mxu0 }
 0x129   :  { %v161_v12 = vpop.f32.mrb[1].mxu0 }
 0x12a   :  { %v433_v13 = vpack.c.bf16 %v407_v11, %v161_v12 }
 0x12c   :  { %v410_v14 = vpop.f32.mrb[2].mxu0  ;;  %434 = vmatprep.subr.bf16.mxu1 %v433_v13 }
 0x12d   :  { %v171_v15 = vpop.f32.mrb[3].mxu0  ;;  %436 = vmatpush3.bf16.msra.mxu1 %v433_v13 }
 0x12e   :  { %v437_v17 = vpack.c.bf16 %v410_v14, %v171_v15 }
 0x130   :  { %416 = vmatmul.mubr.msk.f32.vlgmr.msra.gmra.mrb[0].mxu1 %vm186_vm1, %v72_v16  ;;  %438 = vmatprep.subr.bf16.mxu1 %v437_v17 }
 0x131   :  { %440 = vmatpush3.bf16.msra.mxu1 %v437_v17  ;;  %422 = vmatprep.mubr.msk.f32.mxu1 %vm186_vm1, %v71_v10 }
 0x134   :  { %423 = vmatmul.mubr.msk.f32.vlgmr.msra.gmra.mrb[2].mxu1 %vm186_vm1, %v72_v16 }
 0x203   :  { %v417_v19 = vpop.f32.mrb[0].mxu1 }
 0x204   :  { %v265_v20 = vadd.f32 %v417_v19, %v376_v18  ;;  %v259_v21 = vpop.f32.mrb[1].mxu1 }
 0x205   :  { %v260_v22 = vadd.f32 %v376_v18, %v259_v21 }
 0x206   :  { %v269_v23 = vmax.f32 %v265_v20, 0.0 }
 0x207   :  { %v268_v24 = vmax.f32 %v260_v22, 0.0  ;;  %v424_v25 = vpop.f32.mrb[2].mxu1 }
 0x208   :  { %272 = vst.msk [vmem:[#allocation10 + $0x8] sm:$0xff] %vm270_vm2, %v269_v23  ;;  %v345_v26 = vadd.f32 %v424_v25, %v376_v18  ;;  %v339_v27 = vpop.f32.mrb[3].mxu1 }
 0x209   :  { %271 = vst.msk [vmem:[#allocation10] sm:$0xff] %vm270_vm2, %v268_v24  ;;  %v340_v28 = vadd.f32 %v376_v18, %v339_v27 }
 0x20a   :  { %v349_v29 = vmax.f32 %v345_v26, 0.0 }
 0x20b   :  { %v348_v30 = vmax.f32 %v340_v28, 0.0 }
 0x20c   :  { %352 = vst.msk [vmem:[#allocation10 + $0x18] sm:$0xff] %vm270_vm2, %v349_v29 }
 0x20d   :  { %351 = vst.msk [vmem:[#allocation10 + $0x10] sm:$0xff] %vm270_vm2, %v348_v30 }
 0x20e   :  { %547 = shalt.err (!%p544_p8)
}
 0x20f   :  { %s548_s16 = scalar_lea.hbm %s689_s4, 512 }
 0x210   :  { %p549_p9 = scmp.ne.s32.totalorder %s689_s4, %s548_s16  ;;  %p552_p10 = scmp.lt.u32.totalorder %s548_s16, %s689_s4 }
 0x212   :  { %p554_p11 = pnand %p552_p10, %p549_p9 }
 0x214   :  { %557 = shalt.err (!%p554_p11)
}
 0x215   :  { %364 = dma.vmem_to_hbm [thread:$0]  %s359_s1, 512, %s689_s4, [#allocation4], %s568_s27, %s568_s27, %s569_s28  }
 0x216   :  { %564 = dma.done.wait [#allocation4], 512  }
 0x217   :  { %565 = vsyncadd [#allocation4], 4294966784 }
 0x218   :  { %368 = vsyncpa [#allocation3], 1 }
 0x219   :  { %369 = vsyncpa [#allocation6], 1 }
 0x21a   :  { %370 = vsyncpa [#allocation9], 1 }
 0x21b   :  { %371 = vsyncpa [#allocation4], 1 }

// kernel: tpu_custom_call.1
= control target key start
LH: loop header
LB: loop body
LE: loop exit
PB: predicated region body
PF: predicated region fallthrough
CT: control target
= control target key end

     0   :  { %9 = vsyncpa [#allocation3], 0  ;;  %s685_s0 = inlined_call_operand.hbm [shape: f32[16,16], index: 0, kind: input, shape index: {}]   ;;  %s686_s1 = inlined_call_operand.hbm [shape: f32[2,16,32], index: 1, kind: input, shape index: {}]   ;;  %s687_s2 = inlined_call_operand.hbm [shape: f32[32,64], index: 2, kind: input, shape index: {}]   ;;  %s688_s3 = inlined_call_operand.hbm [shape: f32[1,64], index: 3, kind: input, shape index: {}]   ;;  %s689_s4 = inlined_call_operand.hbm [shape: f32[2,16,64], index: 4, kind: output, shape index: {}]  }
   0x1   :  { %10 = vsyncpa [#allocation6], 0 }
   0x2   :  { %11 = vsyncpa [#allocation9], 0 }
   0x3   :  { %12 = vsyncpa [#allocation4], 0  ;;  %s566_s15 = smov [#allocation5]   ;;  %s567_s17 = smov [#allocation2]  }
   0x4   :  { %s30_s16 = sshll.u32 %s566_s15, 4  ;;  %s18_s18 = sshll.u32 %s567_s17, 4  ;;  %s31_s16 = int_to_ptr.vmem [resolvable:$true] %s30_s16  ;;  %s598_s18 = int_to_ptr.vmem [resolvable:$true] %s18_s18 }
   0x5   :  { %s448_s21 = scalar_lea.hbm %s686_s1, 512 }
   0x6   :  { %p449_p0 = scmp.ne.s32.totalorder %s686_s1, %s448_s21  ;;  %p452_p1 = scmp.lt.u32.totalorder %s448_s21, %s686_s1 }
   0x8   :  { %p454_p2 = pnand %p452_p1, %p449_p0 }
   0xa   :  { %457 = shalt.err (!%p454_p2)
}
   0xb   :  { %s458_s26 = scalar_lea.vmem %s31_s16, 512  ;;  %p463_p4 = scmp.lt.s32.totalorder %s31_s16, %s31_s16 }
   0xc   :  { %p459_p3 = scmp.ne.s32.totalorder %s31_s16, %s458_s26  ;;  %p464_p5 = scmp.lt.s32.totalorder %s458_s26, %s458_s26 }
   0xe   :  { %p465_p6 = por %p464_p5, %p463_p4 }
  0x10   :  { %p466_p7 = pnand %p465_p6, %p459_p3 }
  0x12   :  { %469 = shalt.err (!%p466_p7)
}
  0x13   :  { %s568_s27 = smov 128   ;;  %s569_s28 = smov 8  }
  0x14   :  { %36 = dma.hbm_to_vmem [thread:$0]  %s686_s1, 512, %s31_s16, [#allocation6], %s568_s27, %s568_s27, %s569_s28  }
  0x15   :  { %s470_s7 = scalar_lea.hbm %s685_s0, 256 }
  0x16   :  { %p471_p8 = scmp.ne.s32.totalorder %s685_s0, %s470_s7  ;;  %p474_p9 = scmp.lt.u32.totalorder %s470_s7, %s685_s0 }
  0x18   :  { %p476_p10 = pnand %p474_p9, %p471_p8 }
  0x1a   :  { %479 = shalt.err (!%p476_p10)
}
  0x1b   :  { %s480_s12 = scalar_lea.vmem %s598_s18, 256  ;;  %p485_p12 = scmp.lt.s32.totalorder %s598_s18, %s598_s18 }
  0x1c   :  { %p481_p11 = scmp.ne.s32.totalorder %s598_s18, %s480_s12  ;;  %p486_p13 = scmp.lt.s32.totalorder %s480_s12, %s480_s12 }
  0x1e   :  { %p487_p0 = por %p486_p13, %p485_p12 }
  0x20   :  { %p488_p1 = pnand %p487_p0, %p481_p11 }
  0x22   :  { %491 = shalt.err (!%p488_p1)
}
  0x23   :  { %24 = dma.hbm_to_vmem [thread:$0]  %s685_s0, 256, %s598_s18, [#allocation3], %s568_s27, %s568_s27, %s569_s28  }
  0x24   :  { %s570_s14 = smov [#allocation7]   ;;  %s571_s16 = smov [#allocation8]  }
  0x25   :  { %s42_s15 = sshll.u32 %s570_s14, 4  ;;  %s55_s17 = sshll.u32 %s571_s16, 4  ;;  %s43_s15 = int_to_ptr.vmem [resolvable:$true] %s42_s15  ;;  %s56_s17 = int_to_ptr.vmem [resolvable:$true] %s55_s17 }
  0x26   :  { %s492_s21 = scalar_lea.hbm %s687_s2, 512 }
  0x27   :  { %p493_p2 = scmp.ne.s32.totalorder %s687_s2, %s492_s21  ;;  %p496_p3 = scmp.lt.u32.totalorder %s492_s21, %s687_s2 }
  0x29   :  { %p498_p4 = pnand %p496_p3, %p493_p2 }
  0x2b   :  { %501 = shalt.err (!%p498_p4)
}
  0x2c   :  { %s502_s0 = scalar_lea.vmem %s43_s15, 512  ;;  %p507_p6 = scmp.lt.s32.totalorder %s43_s15, %s43_s15 }
  0x2d   :  { %p503_p5 = scmp.ne.s32.totalorder %s43_s15, %s502_s0  ;;  %p508_p7 = scmp.lt.s32.totalorder %s502_s0, %s502_s0 }
  0x2f   :  { %p509_p8 = por %p508_p7, %p507_p6 }
  0x31   :  { %p510_p9 = pnand %p509_p8, %p503_p5 }
  0x33   :  { %513 = shalt.err (!%p510_p9)
}
  0x34   :  { %48 = dma.hbm_to_vmem [thread:$0]  %s687_s2, 512, %s43_s15, [#allocation6], %s568_s27, %s568_s27, %s569_s28  }
  0x35   :  { %s514_s5 = scalar_lea.hbm %s688_s3, 16 }
  0x36   :  { %p515_p10 = scmp.ne.s32.totalorder %s688_s3, %s514_s5  ;;  %p518_p11 = scmp.lt.u32.totalorder %s514_s5, %s688_s3 }
  0x38   :  { %p520_p12 = pnand %p518_p11, %p515_p10 }
  0x3a   :  { %523 = shalt.err (!%p520_p12)
}
  0x3b   :  { %s524_s10 = scalar_lea.vmem %s56_s17, 16  ;;  %s528_s11 = scalar_lea.vmem %s56_s17, 32 }
  0x3c   :  { %p525_p13 = scmp.ne.s32.totalorder %s56_s17, %s524_s10  ;;  %p529_p0 = scmp.lt.s32.totalorder %s56_s17, %s56_s17 }
  0x3d   :  { %p530_p1 = scmp.lt.s32.totalorder %s528_s11, %s524_s10 }
  0x3f   :  { %p531_p2 = por %p530_p1, %p529_p0 }
  0x41   :  { %p532_p3 = pnand %p531_p2, %p525_p13 }
  0x43   :  { %535 = shalt.err (!%p532_p3)
}
  0x44   :  { %58 = dma.hbm_to_vmem [thread:$0]  %s688_s3, 16, %s56_s17, [#allocation9]  }
  0x45   :  { %558 = dma.done.wait [#allocation3], 256  }
  0x46   :  { %559 = vsyncadd [#allocation3], 4294967040 }
  0x47   :  { %560 = dma.done.wait [#allocation6], 1024  }
  0x48   :  { %561 = vsyncadd [#allocation6], 4294966272 }
  0x49   :  { %562 = dma.done.wait [#allocation9], 16  }
  0x4a   :  { %563 = vsyncadd [#allocation9], 4294967280  ;;  %vm82_vm0 = vcmask 261120   ;;  %v78_v0 = vld [vmem:[#allocation7] sm:$0xff]  ;;  %v79_v1 = vld [vmem:[#allocation7 + $0x8] sm:$0xff]  ;;  %vm186_vm1 = vcmask 130048  }
  0x4b   :  { %v80_v2 = vld [vmem:[#allocation7 + $0x10] sm:$0xff]  ;;  %v425_v3 = vpack.c.bf16 %v79_v1, %v78_v0  ;;  %v81_v4 = vld [vmem:[#allocation7 + $0x18] sm:$0xff]  ;;  %v74_v5 = vld [vmem:[#allocation5] sm:$0xff]  ;;  %vm270_vm2 = vcmask 523264   ;;  %s572_s3 = smov [#allocation10]  }
  0x4c   :  { %v429_v6 = vpack.c.bf16 %v81_v4, %v80_v2  ;;  %405 = vmatprep.mubr.msk.f32.mxu0 %vm82_vm0, %v74_v5  ;;  %v75_v7 = vld [vmem:[#allocation5 + $0x8] sm:$0xff]  ;;  %v76_v8 = vld [vmem:[#allocation5 + $0x10] sm:$0xff]  ;;  %v77_v9 = vld [vmem:[#allocation5 + $0x18] sm:$0xff]  ;;  %s358_s1 = sshll.u32 %s572_s3, 4  ;;  %s359_s1 = int_to_ptr.vmem [resolvable:$true] %s358_s1 }
  0x4d   :  { %426 = vmatprep.subr.bf16.mxu0 %v425_v3  ;;  %v71_v10 = vld [vmem:[#allocation2] sm:$0xff]  ;;  %v72_v16 = vld [vmem:[#allocation2 + $0x8] sm:$0xff]  ;;  %v376_v18 = vld [vmem:[#allocation8] ss:$0 sm:$0xff]  ;;  %s536_s13 = scalar_lea.vmem %s359_s1, 512  ;;  %p541_p5 = scmp.lt.s32.totalorder %s359_s1, %s359_s1 }
  0x4e   :  { %428 = vmatpush3.bf16.msra.mxu0 %v425_v3  ;;  %415 = vmatprep.mubr.msk.f32.mxu1 %vm186_vm1, %v71_v10  ;;  %p537_p4 = scmp.ne.s32.totalorder %s359_s1, %s536_s13  ;;  %p542_p6 = scmp.lt.s32.totalorder %s536_s13, %s536_s13 }
  0x4f   :  { %430 = vmatprep.subr.bf16.mxu0 %v429_v6 }
  0x50   :  { %p543_p7 = por %p542_p6, %p541_p5 }
  0x52   :  { %432 = vmatpush3.bf16.msra.mxu0 %v429_v6  ;;  %p544_p8 = pnand %p543_p7, %p537_p4 }
  0x55   :  { %406 = vmatmul.mubr.msk.f32.vlgmr.msra.gmra.mrb[0].mxu0 %vm82_vm0, %v75_v7 }
  0x56   :  { %408 = vmatprep.mubr.msk.f32.mxu0 %vm82_vm0, %v76_v8 }
  0x59   :  { %409 = vmatmul.mubr.msk.f32.gmra.mrb[2].mxu0 %vm82_vm0, %v77_v9 }
 0x128   :  { %v407_v11 = vpop.f32.mrb[0].mxu0 }
 0x129   :  { %v161_v12 = vpop.f32.mrb[1].mxu0 }
 0x12a   :  { %v433_v13 = vpack.c.bf16 %v407_v11, %v161_v12 }
 0x12c   :  { %v410_v14 = vpop.f32.mrb[2].mxu0  ;;  %434 = vmatprep.subr.bf16.mxu1 %v433_v13 }
 0x12d   :  { %v171_v15 = vpop.f32.mrb[3].mxu0  ;;  %436 = vmatpush3.bf16.msra.mxu1 %v433_v13 }
 0x12e   :  { %v437_v17 = vpack.c.bf16 %v410_v14, %v171_v15 }
 0x130   :  { %416 = vmatmul.mubr.msk.f32.vlgmr.msra.gmra.mrb[0].mxu1 %vm186_vm1, %v72_v16  ;;  %438 = vmatprep.subr.bf16.mxu1 %v437_v17 }
 0x131   :  { %440 = vmatpush3.bf16.msra.mxu1 %v437_v17  ;;  %422 = vmatprep.mubr.msk.f32.mxu1 %vm186_vm1, %v71_v10 }
 0x134   :  { %423 = vmatmul.mubr.msk.f32.vlgmr.msra.gmra.mrb[2].mxu1 %vm186_vm1, %v72_v16 }
 0x203   :  { %v417_v19 = vpop.f32.mrb[0].mxu1 }
 0x204   :  { %v265_v20 = vadd.f32 %v417_v19, %v376_v18  ;;  %v259_v21 = vpop.f32.mrb[1].mxu1 }
 0x205   :  { %v260_v22 = vadd.f32 %v376_v18, %v259_v21 }
 0x206   :  { %v269_v23 = vmax.f32 %v265_v20, 0.0 }
 0x207   :  { %v268_v24 = vmax.f32 %v260_v22, 0.0  ;;  %v424_v25 = vpop.f32.mrb[2].mxu1 }
 0x208   :  { %272 = vst.msk [vmem:[#allocation10 + $0x8] sm:$0xff] %vm270_vm2, %v269_v23  ;;  %v345_v26 = vadd.f32 %v424_v25, %v376_v18  ;;  %v339_v27 = vpop.f32.mrb[3].mxu1 }
 0x209   :  { %271 = vst.msk [vmem:[#allocation10] sm:$0xff] %vm270_vm2, %v268_v24  ;;  %v340_v28 = vadd.f32 %v376_v18, %v339_v27 }
 0x20a   :  { %v349_v29 = vmax.f32 %v345_v26, 0.0 }
 0x20b   :  { %v348_v30 = vmax.f32 %v340_v28, 0.0 }
 0x20c   :  { %352 = vst.msk [vmem:[#allocation10 + $0x18] sm:$0xff] %vm270_vm2, %v349_v29 }
 0x20d   :  { %351 = vst.msk [vmem:[#allocation10 + $0x10] sm:$0xff] %vm270_vm2, %v348_v30 }
 0x20e   :  { %547 = shalt.err (!%p544_p8)
}
 0x20f   :  { %s548_s16 = scalar_lea.hbm %s689_s4, 512 }
 0x210   :  { %p549_p9 = scmp.ne.s32.totalorder %s689_s4, %s548_s16  ;;  %p552_p10 = scmp.lt.u32.totalorder %s548_s16, %s689_s4 }
 0x212   :  { %p554_p11 = pnand %p552_p10, %p549_p9 }
 0x214   :  { %557 = shalt.err (!%p554_p11)
}
 0x215   :  { %364 = dma.vmem_to_hbm [thread:$0]  %s359_s1, 512, %s689_s4, [#allocation4], %s568_s27, %s568_s27, %s569_s28  }
 0x216   :  { %564 = dma.done.wait [#allocation4], 512  }
 0x217   :  { %565 = vsyncadd [#allocation4], 4294966784 }
 0x218   :  { %368 = vsyncpa [#allocation3], 1 }
 0x219   :  { %369 = vsyncpa [#allocation6], 1 }
 0x21a   :  { %370 = vsyncpa [#allocation9], 1 }
 0x21b   :  { %371 = vsyncpa [#allocation4], 1 }

</bundles_post_ra>
